<compile_context>
chip_gen: v7x
topology: tpu7x:2x2x1
jax: 0.10.0
libtpu: 0.0.40
codegen_flags: <defaults>
</compile_context>

<pallas_src>
import functools

import jax
import jax.numpy as jnp
from jax import lax
from jax.experimental import pallas as pl
from jax.experimental.pallas import tpu as pltpu

_CONTRAST_PAD_LABEL = jnp.iinfo(jnp.int32).min       # never equals a real label
_ANCHOR_PAD_LABEL = jnp.iinfo(jnp.int32).min + 1     # padded anchor rows (discarded)


def _round_up(x, m):
    return (x + m - 1) // m * m


def _supcon_kernel(alab_ref, clab_ref, anchor_ref, contrast_ref,
                   nlin_ref, logden_ref,
                   m_sc, l_sc, nlin_sc,
                   *, margin, tm, tk, n_real, n_pad):
    """Online-softmax SupCon row statistics for one (row-tile, contrast-tile)."""
    i = pl.program_id(0)          # anchor row tile (parallel)
    k = pl.program_id(1)          # contrast column tile (reduction axis)

    @pl.when(k == 0)
    def _():
        m_sc[...] = jnp.full((1, tm), -jnp.inf, jnp.float32)
        l_sc[...] = jnp.zeros((1, tm), jnp.float32)
        nlin_sc[...] = jnp.zeros((1, tm), jnp.float32)

    # st[j, r] = <contrast_j, anchor_r> / T   (1/T pre-folded into the anchor).
    # (TK, TM): anchor rows live on lanes -> lane-dense (1, TM) accumulators.
    st = lax.dot_general(contrast_ref[...], anchor_ref[...],
                         (((1,), (1,)), ((), ())),
                         preferred_element_type=jnp.float32)

    # Masks rebuilt in-register from small iotas + broadcasted compares.
    a_row = lax.broadcasted_iota(jnp.int32, (1, tm), 1) + i * tm    # global anchor idx
    c_col = lax.broadcasted_iota(jnp.int32, (tk, 1), 0) + k * tk    # global contrast idx
    not_self = a_row != c_col                                       # (tk, tm)
    if n_pad != n_real:                                             # static: only if padded
        keep = jnp.logical_and(not_self, c_col < n_real)
    else:
        keep = not_self

    # Contrast-label column resident in VMEM; slice the current tile.
    clab = clab_ref[pl.ds(pl.multiple_of(k * tk, 128), tk), :]      # (tk, 1)
    # Sentinel-padded contrast labels never match real anchor labels -> no c_valid here.
    posf = jnp.logical_and(alab_ref[...] == clab, not_self)         # (tk, tm) bool

    # Online softmax update (margin subtracted from positive logits, as in ref).
    m_prev = m_sc[...]
    m_new = jnp.maximum(m_prev, jnp.max(st, axis=0, keepdims=True))  # (1, tm)
    if margin != 0.0:
        sm = st - margin
        shifted = jnp.where(posf, sm, st) - m_new
        nlin_term = jnp.where(posf, sm, 0.0)
    else:
        shifted = st - m_new
        nlin_term = jnp.where(posf, st, 0.0)
    p = jnp.where(keep, jnp.exp(shifted), 0.0)
    l_sc[...] = l_sc[...] * jnp.exp(m_prev - m_new) + jnp.sum(p, axis=0, keepdims=True)
    nlin_sc[...] = nlin_sc[...] + jnp.sum(nlin_term, axis=0, keepdims=True)
    m_sc[...] = m_new

    @pl.when(k == pl.num_programs(1) - 1)
    def _():
        # log sum_j keep_j * exp(s_j - margin*pos_j)  (row max cancels exactly)
        nlin_ref[...] = nlin_sc[...].reshape(1, 1, tm)
        logden_ref[...] = (m_sc[...] + jnp.log(l_sc[...])).reshape(1, 1, tm)


def _supcon_dense_ref(anchor, contrast, big_mask, margin, temperature,
                      base_temperature):
    """Pure-JAX dense SupCon (mirrors the PyTorch forward). Used as the
    arbitrary-mask fallback and as the correctness reference in the test."""
    anchor = anchor.astype(jnp.float32)
    contrast = contrast.astype(jnp.float32)
    big_mask = big_mask.astype(jnp.float32)
    s = (anchor @ contrast.T) / temperature
    logits = s - jnp.max(s, axis=1, keepdims=True)
    A, N = big_mask.shape
    logits_mask = (jnp.arange(A)[:, None] != jnp.arange(N)[None, :]).astype(jnp.float32)
    big_mask = big_mask * logits_mask
    logits = logits - margin * (big_mask > 0).astype(jnp.float32)
    exp_logits = jnp.exp(logits) * logits_mask
    log_prob = logits - jnp.log(jnp.sum(exp_logits, axis=1, keepdims=True))
    numer = jnp.sum(big_mask * log_prob, axis=1)
    msum = jnp.sum(big_mask, axis=1)
    valid = msum > 0
    mean_log_prob_pos = numer / jnp.where(valid, msum, 1.0)
    per_row = -(temperature / base_temperature) * mean_log_prob_pos
    return (jnp.sum(jnp.where(valid, per_row, 0.0))
            / jnp.maximum(jnp.sum(valid.astype(jnp.float32)), 1.0))


def supcon_loss(features, labels=None, mask=None, margin=0.0,
                temperature=0.07, contrast_mode='all', base_temperature=0.07):
    """JAX / Pallas equivalent of SupConLoss.forward ('all' and 'one' modes)."""
    if features.ndim < 3:
        raise ValueError('`features` needs to be [bsz, n_views, ...], '
                         'at least 3 dimensions are required')
    if features.ndim > 3:
        features = features.reshape(features.shape[0], features.shape[1], -1)
    if contrast_mode not in ('one', 'all'):
        raise ValueError(f'Unknown mode: {contrast_mode}')
    bsz, n_views, dim = features.shape

    if labels is not None and mask is not None:
        raise ValueError('Cannot define both `labels` and `mask`')

    # view-major stacking == torch.cat(torch.unbind(features, dim=1), dim=0)
    contrast_feature = jnp.concatenate(
        [features[:, v] for v in range(n_views)], axis=0)            # (N, D)

    if mask is not None:
        # TODO(synk): arbitrary (possibly asymmetric / non-binary) user masks are
        # not label-decomposable; this rare path uses the dense pure-JAX fallback.
        anchor_feature = features[:, 0] if contrast_mode == 'one' else contrast_feature
        anchor_count = 1 if contrast_mode == 'one' else n_views
        big_mask = jnp.tile(jnp.asarray(mask, jnp.float32), (anchor_count, n_views))
        return _supcon_dense_ref(anchor_feature, contrast_feature, big_mask,
                                 float(margin), float(temperature),
                                 float(base_temperature))

    if labels is None:
        base_labels = jnp.arange(bsz, dtype=jnp.int32)     # eye mask == SimCLR
    else:
        base_labels = jnp.asarray(labels).reshape(-1).astype(jnp.int32)
        if base_labels.shape[0] != bsz:
            raise ValueError('Num of labels does not match num of features')

    contrast_labels = jnp.tile(base_labels, n_views)        # (N,)
    if contrast_mode == 'one':
        anchor_feature, anchor_labels = features[:, 0], base_labels
    else:
        anchor_feature, anchor_labels = contrast_feature, contrast_labels

    A, D = anchor_feature.shape
    N = contrast_feature.shape[0]

    D_pad = _round_up(D, 128)                 # full lanes / MXU contraction depth
    a128 = _round_up(A, 128)
    TM = 256 if a128 >= 512 else 128          # 256-wide MXU on v6e/v7x; keep GR >= 2
    A_pad = _round_up(A, TM)
    GR = A_pad // TM

    n128 = _round_up(N, 128)
    cap = 1024 if D_pad <= 256 else 512       # big contrast tiles amortize step cost
    TK = min(cap, n128)
    if n128 % TK != 0:                        # prefer a divisor to avoid padding waste
        for cand in range(TK - 128, 255, -128):
            if n128 % cand == 0:
                TK = cand
                break
    N_pad = _round_up(N, TK)
    GK = N_pad // TK

    inv_temp = 1.0 / float(temperature)
    # 1/T folded into the anchor cast/pad (fuses in XLA, no in-kernel rescale).
    a_p = jnp.pad((anchor_feature.astype(jnp.float32) * inv_temp).astype(jnp.bfloat16),
                  ((0, A_pad - A), (0, D_pad - D)))
    c_p = jnp.pad(contrast_feature.astype(jnp.bfloat16),
                  ((0, N_pad - N), (0, D_pad - D)))
    # Sentinel-padded labels: padded contrast columns can never be positives.
    alab = jnp.pad(anchor_labels, (0, A_pad - A),
                   constant_values=_ANCHOR_PAD_LABEL)[None, :]        # (1, A_pad)
    clab = jnp.pad(contrast_labels, (0, N_pad - N),
                   constant_values=_CONTRAST_PAD_LABEL)[:, None]      # (N_pad, 1)

    kernel = functools.partial(
        _supcon_kernel, margin=float(margin), tm=TM, tk=TK, n_real=N, n_pad=N_pad)

    # Working-set estimate (double-buffered bf16 tiles + resident label column +
    # a handful of (TK,TM) f32 temporaries); keep within v7x's 64 MiB.
    vmem_est = (2 * TM * D_pad * 2 + 3 * TK * D_pad * 2 + 2 * N_pad * 512
                + 8 * TK * TM * 4 + (2 << 20))
    vmem_limit = int(min(max(vmem_est, 32 << 20), 64 << 20))

    nlin, logden = pl.pallas_call(
        kernel,
        out_shape=(jax.ShapeDtypeStruct((GR, 1, TM), jnp.float32),
                   jax.ShapeDtypeStruct((GR, 1, TM), jnp.float32)),
        grid_spec=pltpu.PrefetchScalarGridSpec(
            num_scalar_prefetch=0,
            grid=(GR, GK),
            in_specs=[
                pl.BlockSpec((1, TM), lambda i, k: (0, i)),       # anchor labels
                pl.BlockSpec((N_pad, 1), lambda i, k: (0, 0)),    # contrast labels (resident)
                pl.BlockSpec((TM, D_pad), lambda i, k: (i, 0)),   # anchor tile
                pl.BlockSpec((TK, D_pad), lambda i, k: (k, 0)),   # contrast tile
            ],
            out_specs=[
                pl.BlockSpec((1, 1, TM), lambda i, k: (i, 0, 0)),
                pl.BlockSpec((1, 1, TM), lambda i, k: (i, 0, 0)),
            ],
            scratch_shapes=[
                pltpu.VMEM((1, TM), jnp.float32),        # running row max
                pltpu.VMEM((1, TM), jnp.float32),        # running exp-sum
                pltpu.VMEM((1, TM), jnp.float32),        # running sum pos*(s-margin)
            ],
        ),
        compiler_params=pltpu.CompilerParams(
            dimension_semantics=("parallel", "arbitrary"),
            vmem_limit_bytes=vmem_limit),
    )(alab, clab, a_p, c_p)

    nlin = nlin.reshape(-1)[:A]
    logden = logden.reshape(-1)[:A]

    # Analytic positive counts: n_views * (#same-label samples) - 1 (self excluded).
    counts = jnp.sum((base_labels[None, :] == base_labels[:, None]).astype(jnp.float32),
                     axis=1)
    msum_base = n_views * counts - 1.0
    msum = msum_base if contrast_mode == 'one' else jnp.tile(msum_base, n_views)

    numer = nlin - msum * logden
    valid = msum > 0
    mean_log_prob_pos = numer / jnp.where(valid, msum, 1.0)
    per_row = -(temperature / base_temperature) * mean_log_prob_pos
    n_valid = jnp.sum(valid.astype(jnp.float32))
    # mean over rows with at least one positive (guarded against zero valid rows)
    return jnp.sum(jnp.where(valid, per_row, 0.0)) / jnp.maximum(n_valid, 1.0)


def _supcon_loss_ref(features, labels=None, margin=0.0, temperature=0.07,
                     contrast_mode='all', base_temperature=0.07):
    """Pure-JAX f32 reference mirroring the PyTorch module."""
    features = features.astype(jnp.float32)
    bsz, n_views = features.shape[:2]
    if labels is None:
        small_mask = jnp.eye(bsz, dtype=jnp.float32)
    else:
        labels = labels.reshape(-1, 1)
        small_mask = (labels == labels.T).astype(jnp.float32)
    cf = jnp.concatenate([features[:, v] for v in range(n_views)], axis=0)
    if contrast_mode == 'one':
        af, ac = features[:, 0], 1
    else:
        af, ac = cf, n_views
    big = jnp.tile(small_mask, (ac, n_views))
    return _supcon_dense_ref(af, cf, big, margin, temperature, base_temperature)


if __name__ == "__main__":
    key = jax.random.PRNGKey(0)
    k1, k2 = jax.random.split(key)

    bsz, n_views, dim = 8, 2, 32
    feats = jax.random.normal(k1, (bsz, n_views, dim), dtype=jnp.float32)
    feats = feats / jnp.linalg.norm(feats, axis=-1, keepdims=True)  # standard SupCon usage
    labels = jax.random.randint(k2, (bsz,), 0, 3)

    # supervised ('all') path through the Pallas kernel
    loss = jax.block_until_ready(supcon_loss(feats, labels=labels, margin=0.1))
    ref = jax.block_until_ready(_supcon_loss_ref(feats, labels=labels, margin=0.1))
    assert jnp.isfinite(loss), "loss is not finite"
    assert jnp.allclose(loss, ref, rtol=3e-2, atol=3e-2), (loss, ref)

    # 'one' contrast mode
    loss1 = jax.block_until_ready(
        supcon_loss(feats, labels=labels, margin=0.1, contrast_mode='one'))
    ref1 = _supcon_loss_ref(feats, labels=labels, margin=0.1, contrast_mode='one')
    assert jnp.allclose(loss1, ref1, rtol=3e-2, atol=3e-2), (loss1, ref1)

    # unsupervised (SimCLR / eye-mask) path, margin=0 branch
    loss2 = jax.block_until_ready(supcon_loss(feats))
    ref2 = _supcon_loss_ref(feats)
    assert jnp.allclose(loss2, ref2, rtol=3e-2, atol=3e-2), (loss2, ref2)

    print("KERNEL_OK")
</pallas_src>

<mosaic_0001>
module attributes {stable_mosaic.version = 11 : i64} {
  func.func @_supcon_kernel(%arg0: i32, %arg1: i32, %arg2: memref<1x128xi32, #tpu.memory_space<vmem>>, %arg3: memref<128x1xi32, #tpu.memory_space<vmem>>, %arg4: memref<128x128xbf16, #tpu.memory_space<vmem>>, %arg5: memref<128x128xbf16, #tpu.memory_space<vmem>>, %arg6: memref<1x1x128xf32, #tpu.memory_space<vmem>>, %arg7: memref<1x1x128xf32, #tpu.memory_space<vmem>>, %arg8: memref<1x128xf32, #tpu.memory_space<vmem>>, %arg9: memref<1x128xf32, #tpu.memory_space<vmem>>, %arg10: memref<1x128xf32, #tpu.memory_space<vmem>>) attributes {dimension_semantics = [#tpu.dimension_semantics<parallel>, #tpu.dimension_semantics<arbitrary>], iteration_bounds = array<i64: 1, 1>, scalar_prefetch = 0 : i64, scratch_operands = 3 : i64, tpu.core_type = #tpu.core_type<tc>, window_params = [{transform_indices = @transform_0, window_bounds = array<i64: 1, 128>}, {pipeline_mode = #tpu.pipeline_mode<synchronous>, transform_indices = @transform_1, window_bounds = array<i64: 128, 1>}, {transform_indices = @transform_2, window_bounds = array<i64: 128, 128>}, {transform_indices = @transform_3, window_bounds = array<i64: 128, 128>}, {transform_indices = @transform_4, window_bounds = array<i64: 1, 1, 128>}, {transform_indices = @transform_5, window_bounds = array<i64: 1, 1, 128>}]} {
    %c0_i32 = arith.constant 0 : i32
    %0 = arith.cmpi eq, %arg1, %c0_i32 : i32
    %1 = arith.extui %0 : i1 to i32
    %c0_i32_0 = arith.constant 0 : i32
    %2 = arith.cmpi ne, %1, %c0_i32_0 : i32
    scf.if %2 {
      %cst_29 = arith.constant 0xFF800000 : f32
      %61 = vector.broadcast %cst_29 : f32 to vector<1x128xf32>
      %c0_30 = arith.constant 0 : index
      %c0_31 = arith.constant 0 : index
      %62 = vector.load %arg8[%c0_30, %c0_31] : memref<1x128xf32, #tpu.memory_space<vmem>>, vector<1x128xf32>
      tpu.vector_store %arg8[%c0_30, %c0_31], %61 {strides = array<i32>} : memref<1x128xf32, #tpu.memory_space<vmem>>, vector<1x128xf32>,
      %cst_32 = arith.constant 0.000000e+00 : f32
      %63 = vector.broadcast %cst_32 : f32 to vector<1x128xf32>
      %c0_33 = arith.constant 0 : index
      %c0_34 = arith.constant 0 : index
      %64 = vector.load %arg9[%c0_33, %c0_34] : memref<1x128xf32, #tpu.memory_space<vmem>>, vector<1x128xf32>
      tpu.vector_store %arg9[%c0_33, %c0_34], %63 {strides = array<i32>} : memref<1x128xf32, #tpu.memory_space<vmem>>, vector<1x128xf32>,
      %cst_35 = arith.constant 0.000000e+00 : f32
      %65 = vector.broadcast %cst_35 : f32 to vector<1x128xf32>
      %c0_36 = arith.constant 0 : index
      %c0_37 = arith.constant 0 : index
      %66 = vector.load %arg10[%c0_36, %c0_37] : memref<1x128xf32, #tpu.memory_space<vmem>>, vector<1x128xf32>
      tpu.vector_store %arg10[%c0_36, %c0_37], %65 {strides = array<i32>} : memref<1x128xf32, #tpu.memory_space<vmem>>, vector<1x128xf32>,
    } else {
    }
    %c0 = arith.constant 0 : index
    %c0_1 = arith.constant 0 : index
    %3 = vector.load %arg5[%c0, %c0_1] : memref<128x128xbf16, #tpu.memory_space<vmem>>, vector<128x128xbf16>
    %c0_2 = arith.constant 0 : index
    %c0_3 = arith.constant 0 : index
    %4 = vector.load %arg4[%c0_2, %c0_3] : memref<128x128xbf16, #tpu.memory_space<vmem>>, vector<128x128xbf16>
    %cst = arith.constant dense<0.000000e+00> : vector<128x128xf32>
    %5 = tpu.matmul %3, %4, %cst {dimension_numbers = #tpu.dot_dimension_numbers<[1], [1], [0], [0], [0, 0, 1, 0], [], []>} : vector<128x128xbf16>, vector<128x128xbf16>, vector<128x128xf32> -> vector<128x128xf32>
    %6 = tpu.iota {dimensions = array<i32: 1>} : vector<1x128xi32>
    %c128_i32 = arith.constant 128 : i32
    %7 = arith.muli %arg0, %c128_i32 : i32
    %8 = vector.broadcast %7 : i32 to vector<1x128xi32>
    %9 = arith.addi %6, %8 : vector<1x128xi32>
    %10 = tpu.iota {dimensions = array<i32: 0>} : vector<128x1xi32>
    %c128_i32_4 = arith.constant 128 : i32
    %11 = arith.muli %arg1, %c128_i32_4 : i32
    %12 = vector.broadcast %11 : i32 to vector<128x1xi32>
    %13 = arith.addi %10, %12 : vector<128x1xi32>
    %14 = vector.broadcast %9 : vector<1x128xi32> to vector<128x128xi32>
    %15 = vector.broadcast %13 : vector<128x1xi32> to vector<128x128xi32>
    %16 = arith.cmpi ne, %14, %15 : vector<128x128xi32>
    %c16_i32 = arith.constant 16 : i32
    %17 = vector.broadcast %c16_i32 : i32 to vector<128x1xi32>
    %18 = arith.cmpi slt, %13, %17 : vector<128x1xi32>
    %19 = vector.broadcast %18 : vector<128x1xi1> to vector<128x128xi1>
    %20 = arith.andi %16, %19 : vector<128x128xi1>
    %c128_i32_5 = arith.constant 128 : i32
    %21 = arith.muli %arg1, %c128_i32_5 : i32
    %22 = tpu.assume_multiple %21, 128 : i32
    %23 = arith.index_cast %22 : i32 to index
    %c0_6 = arith.constant 0 : index
    %24 = vector.load %arg3[%23, %c0_6] : memref<128x1xi32, #tpu.memory_space<vmem>>, vector<128x1xi32>
    %c0_7 = arith.constant 0 : index
    %c0_8 = arith.constant 0 : index
    %25 = vector.load %arg2[%c0_7, %c0_8] : memref<1x128xi32, #tpu.memory_space<vmem>>, vector<1x128xi32>
    %26 = vector.broadcast %25 : vector<1x128xi32> to vector<128x128xi32>
    %27 = vector.broadcast %24 : vector<128x1xi32> to vector<128x128xi32>
    %28 = arith.cmpi eq, %26, %27 : vector<128x128xi32>
    %29 = arith.andi %28, %16 : vector<128x128xi1>
    %c0_9 = arith.constant 0 : index
    %c0_10 = arith.constant 0 : index
    %30 = vector.load %arg8[%c0_9, %c0_10] : memref<1x128xf32, #tpu.memory_space<vmem>>, vector<1x128xf32>
    %cst_11 = arith.constant dense<0xFF800000> : vector<128xf32>
    %31 = vector.multi_reduction <maximumf>, %5, %cst_11 [0] : vector<128x128xf32> to vector<128xf32>
    %32 = vector.shape_cast %31 : vector<128xf32> to vector<1x128xf32>
    %33 = arith.maximumf %30, %32 : vector<1x128xf32>
    %cst_12 = arith.constant 1.000000e-01 : f32
    %34 = vector.broadcast %cst_12 : f32 to vector<128x128xf32>
    %35 = arith.subf %5, %34 : vector<128x128xf32>
    %36 = arith.select %29, %35, %5 : vector<128x128xi1>, vector<128x128xf32>
    %37 = vector.broadcast %33 : vector<1x128xf32> to vector<128x128xf32>
    %38 = arith.subf %36, %37 : vector<128x128xf32>
    %cst_13 = arith.constant 0.000000e+00 : f32
    %39 = vector.broadcast %cst_13 : f32 to vector<128x128xf32>
    %40 = arith.select %29, %35, %39 : vector<128x128xi1>, vector<128x128xf32>
    %41 = math.exp %38 : vector<128x128xf32>
    %cst_14 = arith.constant 0.000000e+00 : f32
    %42 = vector.broadcast %cst_14 : f32 to vector<128x128xf32>
    %43 = arith.select %20, %41, %42 : vector<128x128xi1>, vector<128x128xf32>
    %c0_15 = arith.constant 0 : index
    %c0_16 = arith.constant 0 : index
    %44 = vector.load %arg9[%c0_15, %c0_16] : memref<1x128xf32, #tpu.memory_space<vmem>>, vector<1x128xf32>
    %45 = arith.subf %30, %33 : vector<1x128xf32>
    %46 = math.exp %45 : vector<1x128xf32>
    %47 = arith.mulf %44, %46 : vector<1x128xf32>
    %cst_17 = arith.constant dense<0.000000e+00> : vector<128xf32>
    %48 = vector.multi_reduction <add>, %43, %cst_17 [0] : vector<128x128xf32> to vector<128xf32>
    %49 = vector.shape_cast %48 : vector<128xf32> to vector<1x128xf32>
    %50 = arith.addf %47, %49 : vector<1x128xf32>
    %c0_18 = arith.constant 0 : index
    %c0_19 = arith.constant 0 : index
    %51 = vector.load %arg9[%c0_18, %c0_19] : memref<1x128xf32, #tpu.memory_space<vmem>>, vector<1x128xf32>
    tpu.vector_store %arg9[%c0_18, %c0_19], %50 {strides = array<i32>} : memref<1x128xf32, #tpu.memory_space<vmem>>, vector<1x128xf32>,
    %c0_20 = arith.constant 0 : index
    %c0_21 = arith.constant 0 : index
    %52 = vector.load %arg10[%c0_20, %c0_21] : memref<1x128xf32, #tpu.memory_space<vmem>>, vector<1x128xf32>
    %cst_22 = arith.constant dense<0.000000e+00> : vector<128xf32>
    %53 = vector.multi_reduction <add>, %40, %cst_22 [0] : vector<128x128xf32> to vector<128xf32>
    %54 = vector.shape_cast %53 : vector<128xf32> to vector<1x128xf32>
    %55 = arith.addf %52, %54 : vector<1x128xf32>
    %c0_23 = arith.constant 0 : index
    %c0_24 = arith.constant 0 : index
    %56 = vector.load %arg10[%c0_23, %c0_24] : memref<1x128xf32, #tpu.memory_space<vmem>>, vector<1x128xf32>
    tpu.vector_store %arg10[%c0_23, %c0_24], %55 {strides = array<i32>} : memref<1x128xf32, #tpu.memory_space<vmem>>, vector<1x128xf32>,
    %c0_25 = arith.constant 0 : index
    %c0_26 = arith.constant 0 : index
    %57 = vector.load %arg8[%c0_25, %c0_26] : memref<1x128xf32, #tpu.memory_space<vmem>>, vector<1x128xf32>
    tpu.vector_store %arg8[%c0_25, %c0_26], %33 {strides = array<i32>} : memref<1x128xf32, #tpu.memory_space<vmem>>, vector<1x128xf32>,
    %c0_i32_27 = arith.constant 0 : i32
    %58 = arith.cmpi eq, %arg1, %c0_i32_27 : i32
    %59 = arith.extui %58 : i1 to i32
    %c0_i32_28 = arith.constant 0 : i32
    %60 = arith.cmpi ne, %59, %c0_i32_28 : i32
    scf.if %60 {
      %c0_29 = arith.constant 0 : index
      %c0_30 = arith.constant 0 : index
      %61 = vector.load %arg10[%c0_29, %c0_30] : memref<1x128xf32, #tpu.memory_space<vmem>>, vector<1x128xf32>
      %62 = vector.shape_cast %61 : vector<1x128xf32> to vector<1x1x128xf32>
      %c0_31 = arith.constant 0 : index
      %c0_32 = arith.constant 0 : index
      %c0_33 = arith.constant 0 : index
      %63 = vector.load %arg6[%c0_31, %c0_32, %c0_33] : memref<1x1x128xf32, #tpu.memory_space<vmem>>, vector<1x1x128xf32>
      tpu.vector_store %arg6[%c0_31, %c0_32, %c0_33], %62 {strides = array<i32>} : memref<1x1x128xf32, #tpu.memory_space<vmem>>, vector<1x1x128xf32>,
      %c0_34 = arith.constant 0 : index
      %c0_35 = arith.constant 0 : index
      %64 = vector.load %arg8[%c0_34, %c0_35] : memref<1x128xf32, #tpu.memory_space<vmem>>, vector<1x128xf32>
      %c0_36 = arith.constant 0 : index
      %c0_37 = arith.constant 0 : index
      %65 = vector.load %arg9[%c0_36, %c0_37] : memref<1x128xf32, #tpu.memory_space<vmem>>, vector<1x128xf32>
      %66 = math.log %65 : vector<1x128xf32>
      %67 = arith.addf %64, %66 : vector<1x128xf32>
      %68 = vector.shape_cast %67 : vector<1x128xf32> to vector<1x1x128xf32>
      %c0_38 = arith.constant 0 : index
      %c0_39 = arith.constant 0 : index
      %c0_40 = arith.constant 0 : index
      %69 = vector.load %arg7[%c0_38, %c0_39, %c0_40] : memref<1x1x128xf32, #tpu.memory_space<vmem>>, vector<1x1x128xf32>
      tpu.vector_store %arg7[%c0_38, %c0_39, %c0_40], %68 {strides = array<i32>} : memref<1x1x128xf32, #tpu.memory_space<vmem>>, vector<1x1x128xf32>,
    } else {
    }
    return
  }
  func.func @transform_0(%arg0: i32, %arg1: i32) -> (i32, i32) {
    %c0_i32 = arith.constant 0 : i32
    %c0_i32_0 = arith.constant 0 : i32
    return %c0_i32, %arg0 : i32, i32
  }
  func.func @transform_1(%arg0: i32, %arg1: i32) -> (i32, i32) {
    %c0_i32 = arith.constant 0 : i32
    %c0_i32_0 = arith.constant 0 : i32
    %c0_i32_1 = arith.constant 0 : i32
    return %c0_i32, %c0_i32_0 : i32, i32
  }
  func.func @transform_2(%arg0: i32, %arg1: i32) -> (i32, i32) {
    %c0_i32 = arith.constant 0 : i32
    %c0_i32_0 = arith.constant 0 : i32
    return %arg0, %c0_i32 : i32, i32
  }
  func.func @transform_3(%arg0: i32, %arg1: i32) -> (i32, i32) {
    %c0_i32 = arith.constant 0 : i32
    %c0_i32_0 = arith.constant 0 : i32
    return %arg1, %c0_i32 : i32, i32
  }
  func.func @transform_4(%arg0: i32, %arg1: i32) -> (i32, i32, i32) {
    %c0_i32 = arith.constant 0 : i32
    %c0_i32_0 = arith.constant 0 : i32
    %c0_i32_1 = arith.constant 0 : i32
    return %arg0, %c0_i32, %c0_i32_0 : i32, i32, i32
  }
  func.func @transform_5(%arg0: i32, %arg1: i32) -> (i32, i32, i32) {
    %c0_i32 = arith.constant 0 : i32
    %c0_i32_0 = arith.constant 0 : i32
    %c0_i32_1 = arith.constant 0 : i32
    return %arg0, %c0_i32, %c0_i32_0 : i32, i32, i32
  }
}

</mosaic_0001>

<bundles_post_ra>
// kernel: tpu_custom_call.1
= control target key start
LH: loop header
LB: loop body
LE: loop exit
PB: predicated region body
PF: predicated region fallthrough
CT: control target
= control target key end

     0   :  { %11 = vsyncpa [#allocation6], 0  ;;  %v885_v2 = vmov 0   ;;  %s1298_s0 = inlined_call_operand.vmem [shape: s32[1,128], index: 0, kind: input, shape index: {}]   ;;  %s1299_s1 = inlined_call_operand.vmem [shape: s32[128,1], index: 1, kind: input, shape index: {}]   ;;  %s1300_s2 = inlined_call_operand.vmem [shape: bf16[128,128], index: 2, kind: input, shape index: {}]   ;;  %s1301_s3 = inlined_call_operand.vmem [shape: bf16[128,128], index: 3, kind: input, shape index: {}]   ;;  %s1302_s4 = inlined_call_operand.hbm [shape: f32[1,1,128], index: 4, kind: output, shape index: {0}]   ;;  %s1303_s5 = inlined_call_operand.hbm [shape: f32[1,1,128], index: 5, kind: output, shape index: {1}]  }
   0x1   :  { %v813_v0 = vld [vmem:[%s1300_s2] sm:$0xff]   ;;  %v814_v1 = vld [vmem:[%s1300_s2 + $0x8] sm:$0xff]   ;;  %812 = vset.pattern.permute.xlu1 %v885_v2  ;;  %811 = vset.pattern.permute.xlu0 %v885_v2  ;;  %v815_v3 = vld [vmem:[%s1300_s2 + $0x10] sm:$0xff]  }
   0x2   :  { %758 = vmatprep.subr.bf16.mxu0 %v813_v0  ;;  %790 = vmatprep.subr.bf16.mxu1 %v813_v0  ;;  %v821_v4 = vld [vmem:[%s1301_s3] sm:$0xff]   ;;  %v816_v6 = vld [vmem:[%s1300_s2 + $0x18] sm:$0xff]   ;;  %v377_v7 = vld [vmem:[%s1299_s1 + $0x10] sm:$0xff] }
   0x3   :  { %759 = vmatpush3.bf16.xpose.msra.mxu0 %v813_v0  ;;  %798 = vmatpush3.bf16.xpose.msra.mxu1 %v813_v0  ;;  %v823_v5 = vld [vmem:[%s1301_s3 + $0x20] sm:$0xff]   ;;  %v378_v9 = vld [vmem:[%s1299_s1 + $0x18] sm:$0xff]  ;;  %v376_v10 = vld [vmem:[%s1299_s1 + $0x8] sm:$0xff] }
   0x4   :  { %760 = vmatprep.subr.bf16.mxu0 %v814_v1  ;;  %791 = vmatprep.subr.bf16.mxu1 %v814_v1  ;;  %v375_v8 = vld [vmem:[%s1299_s1] sm:$0xff] }
   0x5   :  { %774 = vmatprep.mubr.bf16.mxu0 %v821_v4  ;;  %782 = vmatprep.mubr.bf16.mxu1 %v823_v5 }
   0x6   :  { %403 = vperm.xlu1 %812, %v377_v7   ;;  %397 = vperm.xlu0 %811, %v375_v8  }
   0xa   :  { %406 = vperm.xlu1 %812, %v378_v9   ;;  %400 = vperm.xlu0 %811, %v376_v10  }
   0xb   :  { %761 = vmatpush3.bf16.xpose.msra.mxu0 %v814_v1  ;;  %799 = vmatpush3.bf16.xpose.msra.mxu1 %v814_v1 }
   0xc   :  { %762 = vmatprep.subr.bf16.mxu0 %v815_v3  ;;  %792 = vmatprep.subr.bf16.mxu1 %v815_v3 }
  0x13   :  { %763 = vmatpush3.bf16.xpose.msra.mxu0 %v815_v3  ;;  %800 = vmatpush3.bf16.xpose.msra.mxu1 %v815_v3 }
  0x14   :  { %764 = vmatprep.subr.bf16.mxu0 %v816_v6  ;;  %793 = vmatprep.subr.bf16.mxu1 %v816_v6 }
  0x15   :  { %12 = vsyncpa [#allocation8], 0  ;;  %v380_v11 = vld [vmem:[%s1299_s1 + $0x28] sm:$0xff]  ;;  %v379_v12 = vld [vmem:[%s1299_s1 + $0x20] sm:$0xff]  ;;  %v886_v33 = vmov -inf   ;;  %v887_v34 = vmov 0.0   ;;  %v254_v39 = vlaneseq }
  0x16   :  { %v817_v13 = vld [vmem:[%s1300_s2 + $0x20] sm:$0xff]   ;;  %412 = vperm.xlu1 %812, %v380_v11   ;;  %409 = vperm.xlu0 %811, %v379_v12   ;;  %v382_v14 = vld [vmem:[%s1299_s1 + $0x38] sm:$0xff]  ;;  %v381_v15 = vld [vmem:[%s1299_s1 + $0x30] sm:$0xff]  ;;  %26 = vst [vmem:[#allocation2] sm:$0x1] %v886_v33 }
  0x17   :  { %v384_v16 = vld [vmem:[%s1299_s1 + $0x48] sm:$0xff]  ;;  %v383_v17 = vld [vmem:[%s1299_s1 + $0x40] sm:$0xff]  ;;  %v386_v19 = vld [vmem:[%s1299_s1 + $0x58] sm:$0xff]  ;;  %27 = vst [vmem:[#allocation3] sm:$0x1] %v887_v34  ;;  %v1018_v42 = vshrl.u32 %v254_v39, 7 }
  0x18   :  { %v818_v18 = vld [vmem:[%s1300_s2 + $0x28] sm:$0xff]   ;;  %v385_v20 = vld [vmem:[%s1299_s1 + $0x50] sm:$0xff]  ;;  %v387_v22 = vld [vmem:[%s1299_s1 + $0x60] sm:$0xff]  ;;  %28 = vst [vmem:[#allocation4] sm:$0x1] %v887_v34  ;;  %v1020_v43 = vand.u32 127, %v254_v39 }
  0x19   :  { %v388_v21 = vld [vmem:[%s1299_s1 + $0x68] sm:$0xff]  ;;  %v819_v23 = vld [vmem:[%s1300_s2 + $0x30] sm:$0xff]   ;;  %v390_v24 = vld [vmem:[%s1299_s1 + $0x78] sm:$0xff]  ;;  %v1028_v45 = vadd.s32 8, %v1018_v42  ;;  %v262_v46 = vadd.s32 16, %v1018_v42  ;;  %v263_v47 = vadd.s32 24, %v1018_v42 }
  0x1a   :  { %418 = vperm.xlu1 %812, %v382_v14   ;;  %415 = vperm.xlu0 %811, %v381_v15   ;;  %v389_v25 = vld [vmem:[%s1299_s1 + $0x70] sm:$0xff]  ;;  %v820_v26 = vld [vmem:[%s1300_s2 + $0x38] sm:$0xff]   ;;  %v822_v27 = vld [vmem:[%s1301_s3 + $0x8] sm:$0xff]   ;;  %vm294_vm0 = vcmp.ne.s32.totalorder %v1020_v43, %v1018_v42  ;;  %v264_v52 = vadd.s32 32, %v1018_v42  ;;  %v265_v60 = vadd.s32 40, %v1018_v42  ;;  %v267_v61 = vadd.s32 56, %v1018_v42 }
  0x1b   :  { %765 = vmatpush3.bf16.xpose.msra.mxu0 %v816_v6  ;;  %801 = vmatpush3.bf16.xpose.msra.mxu1 %v816_v6  ;;  %v824_v28 = vld [vmem:[%s1301_s3 + $0x28] sm:$0xff]   ;;  %v825_v29 = vld [vmem:[%s1301_s3 + $0x10] sm:$0xff]   ;;  %v826_v31 = vld [vmem:[%s1301_s3 + $0x18] sm:$0xff]   ;;  %vm295_vm2 = vcmp.ne.s32.totalorder %v1020_v43, %v1028_v45  ;;  %vm296_vm4 = vcmp.ne.s32.totalorder %v1020_v43, %v262_v46  ;;  %vm297_vm7 = vcmp.ne.s32.totalorder %v1020_v43, %v263_v47  ;;  %v266_v63 = vadd.s32 48, %v1018_v42 }
  0x1c   :  { %766 = vmatprep.subr.bf16.mxu0 %v817_v13  ;;  %794 = vmatprep.subr.bf16.mxu1 %v817_v13  ;;  %v827_v30 = vld [vmem:[%s1301_s3 + $0x30] sm:$0xff]   ;;  %v828_v32 = vld [vmem:[%s1301_s3 + $0x38] sm:$0xff]   ;;  %v1025_v44 = vld [vmem:[%s1298_s0] ss:$0 sm:$0xff]  ;;  %vm298_vm11 = vcmp.ne.s32.totalorder %v1020_v43, %v264_v52  ;;  %vm299_vm14 = vcmp.ne.s32.totalorder %v1020_v43, %v265_v60  ;;  %vm301_vm15 = vcmp.ne.s32.totalorder %v1020_v43, %v267_v61  ;;  %v269_v15 = vadd.s32 72, %v1018_v42  ;;  %s888_s0 = smov [#allocation5]  }
  0x1d   :  { %v270_v46 = vadd.s32 80, %v1018_v42  ;;  %s687_s6 = sshll.u32 %s888_s0, 4  ;;  %s688_s6 = int_to_ptr.vmem [resolvable:$true] %s687_s6 }
  0x1e   :  { %424 = vperm.xlu1 %812, %v384_v16   ;;  %421 = vperm.xlu0 %811, %v383_v17   ;;  %s837_s7 = scalar_lea.vmem %s688_s6, 16  ;;  %s841_s8 = scalar_lea.vmem %s688_s6, 32 }
  0x1f   :  { %p838_p0 = scmp.ne.s32.totalorder %s688_s6, %s837_s7  ;;  %p842_p1 = scmp.lt.s32.totalorder %s688_s6, %s688_s6 }
  0x20   :  { %p843_p2 = scmp.lt.s32.totalorder %s841_s8, %s837_s7 }
  0x22   :  { %430 = vperm.xlu1 %812, %v386_v19   ;;  %427 = vperm.xlu0 %811, %v385_v20   ;;  %v268_v20 = vadd.s32 64, %v1018_v42  ;;  %p844_p3 = por %p843_p2, %p842_p1 }
  0x23   :  { %767 = vmatpush3.bf16.xpose.msra.mxu0 %v817_v13  ;;  %802 = vmatpush3.bf16.xpose.msra.mxu1 %v817_v13 }
  0x24   :  { %768 = vmatprep.subr.bf16.mxu0 %v818_v18  ;;  %795 = vmatprep.subr.bf16.mxu1 %v818_v18  ;;  %p845_p4 = pnand %p844_p3, %p838_p0 }
  0x26   :  { %436 = vperm.xlu1 %812, %v388_v21   ;;  %433 = vperm.xlu0 %811, %v387_v22  }
  0x2a   :  { %442 = vperm.xlu1 %812, %v390_v24   ;;  %439 = vperm.xlu0 %811, %v389_v25  }
  0x2b   :  { %769 = vmatpush3.bf16.xpose.msra.mxu0 %v818_v18  ;;  %803 = vmatpush3.bf16.xpose.msra.mxu1 %v818_v18 }
  0x2c   :  { %770 = vmatprep.subr.bf16.mxu0 %v819_v23  ;;  %796 = vmatprep.subr.bf16.mxu1 %v819_v23 }
  0x33   :  { %771 = vmatpush3.bf16.xpose.msra.mxu0 %v819_v23  ;;  %804 = vmatpush3.bf16.xpose.msra.mxu1 %v819_v23 }
  0x34   :  { %772 = vmatprep.subr.bf16.mxu0 %v820_v26  ;;  %797 = vmatprep.subr.bf16.mxu1 %v820_v26 }
  0x3b   :  { %773 = vmatpush3.bf16.xpose.msra.mxu0 %v820_v26  ;;  %805 = vmatpush3.bf16.xpose.msra.mxu1 %v820_v26 }
  0x42   :  { %775 = vmatmul.mubr.bf16.vlgmr.msra.gmra.mrb[0].mxu0 %v822_v27  ;;  %783 = vmatmul.mubr.bf16.vlgmr.msra.gmra.mrb[0].mxu1 %v824_v28 }
  0x43   :  { %778 = vmatprep.mubr.bf16.mxu0 %v825_v29  ;;  %786 = vmatprep.mubr.bf16.mxu1 %v827_v30 }
  0x4a   :  { %779 = vmatmul.mubr.bf16.gmra.mrb[4].mxu0 %v826_v31  ;;  %787 = vmatmul.mubr.bf16.gmra.mrb[4].mxu1 %v828_v32 }
  0x85   :  { %v404_v35 = vpop.permute.xlu1 %403  ;;  %v398_v36 = vpop.permute.xlu0 %397 }
  0x86   :  { %vm444_vm1 = vcmp.eq.s32.totalorder %v1025_v44, %v398_v36  ;;  %vm446_vm5 = vcmp.eq.s32.totalorder %v1025_v44, %v404_v35 }
  0x87   :  { %vm1054_vm6 = vmand %vm444_vm1, %vm294_vm0  ;;  %vm300_vm1 = vcmp.ne.s32.totalorder %v1020_v43, %v266_v63  ;;  %v271_v63 = vadd.s32 88, %v1018_v42 }
  0x88   :  { %vm1088_vm10 = vmand %vm446_vm5, %vm296_vm4 }
  0x89   :  { %v407_v37 = vpop.permute.xlu1 %406  ;;  %v401_v38 = vpop.permute.xlu0 %400 }
  0x8a   :  { %vm445_vm3 = vcmp.eq.s32.totalorder %v1025_v44, %v401_v38  ;;  %vm447_vm9 = vcmp.eq.s32.totalorder %v1025_v44, %v407_v37 }
  0x8b   :  { %vm1069_vm8 = vmand %vm445_vm3, %vm295_vm2 }
  0x8c   :  { %vm1103_vm13 = vmand %vm447_vm9, %vm297_vm7 }
  0x95   :  { %v1016_v40 = vpop.permute.xlu1 %412  ;;  %v410_v41 = vpop.permute.xlu0 %409 }
  0x96   :  { %vm448_vm12 = vcmp.eq.s32.totalorder %v1025_v44, %v410_v41  ;;  %vm449_vm3 = vcmp.eq.s32.totalorder %v1025_v44, %v1016_v40 }
  0x97   :  { %vm1122_vm4 = vmand %vm448_vm12, %vm298_vm11  ;;  %vm302_vm11 = vcmp.ne.s32.totalorder %v1020_v43, %v268_v20 }
  0x98   :  { %vm1146_vm7 = vmand %vm449_vm3, %vm299_vm14  ;;  %vm303_vm14 = vcmp.ne.s32.totalorder %v1020_v43, %v269_v15  ;;  %vm304_vm3 = vcmp.ne.s32.totalorder %v1020_v43, %v270_v46 }
  0x99   :  { %v1035_v48 = vpop.permute.xlu1 %418  ;;  %v1037_v49 = vpop.permute.xlu0 %415 }
  0x9a   :  { %vm450_vm5 = vcmp.eq.s32.totalorder %v1025_v44, %v1037_v49  ;;  %vm451_vm9 = vcmp.eq.s32.totalorder %v1025_v44, %v1035_v48 }
  0x9d   :  { %v422_v4 = vpop.permute.xlu0 %421  ;;  %v1107_v9 = vpop.permute.xlu1 %424 }
  0x9e   :  { %vm452_vm12 = vcmp.eq.s32.totalorder %v1025_v44, %v422_v4 }
  0xa1   :  { %v428_v32 = vpop.permute.xlu0 %427  ;;  %v431_v41 = vpop.permute.xlu1 %430 }
  0xa5   :  { %v437_v14 = vpop.permute.xlu1 %436 }
 0x115   :  { %v776_v50 = vpop.f32.mrb[0].mxu0  ;;  %v1042_v51 = vpop.f32.mrb[0].mxu1 }
 0x116   :  { %v1045_v53 = vpop.f32.mrb[1].mxu0  ;;  %v1047_v54 = vpop.f32.mrb[1].mxu1  ;;  %v728_v0 = vadd.f32 -0.1, %v776_v50 }
 0x117   :  { %v1059_v56 = vadd.f32 -0.1, %v1045_v53  ;;  %v1061_v57 = vpop.f32.mrb[2].mxu0  ;;  %v1063_v58 = vpop.f32.mrb[2].mxu1  ;;  %v734_v4 = vadd.f32 -0.1, %v1047_v54 }
 0x118   :  { %v1075_v62 = vpop.f32.mrb[3].mxu0  ;;  %v1082_v2 = vpop.f32.mrb[3].mxu1  ;;  %v729_v6 = vadd.f32 -0.1, %v1061_v57  ;;  %v555_v11 = vsel %vm1088_vm10, %v728_v0, 0.0  ;;  %vm1162_vm10 = vmand %vm450_vm5, %vm300_vm1  ;;  %vm453_vm1 = vcmp.eq.s32.totalorder %v1025_v44, %v1107_v9 }
 0x119   :  { %v1080_v1 = vadd.f32 -0.1, %v1075_v62  ;;  %v553_v5 = vsel %vm1054_vm6, %v1059_v56, 0.0  ;;  %vm1206_vm5 = vmand %vm453_vm1, %vm303_vm14  ;;  %vm457_vm1 = vcmp.eq.s32.totalorder %v1025_v44, %v437_v14  ;;  %v645_v14 = vld [vmem:[#allocation4] sm:$0x1] }
 0x11a   :  { %v556_v21 = vsel %vm1103_vm13, %v729_v6, 0.0  ;;  %vm1179_vm13 = vmand %vm451_vm9, %vm301_vm15  ;;  %v434_v6 = vpop.permute.xlu0 %433  ;;  %vm455_vm9 = vcmp.eq.s32.totalorder %v1025_v44, %v431_v41 }
 0x11b   :  { %v554_v7 = vsel %vm1069_vm8, %v1080_v1, 0.0  ;;  %vm1194_vm15 = vmand %vm452_vm12, %vm302_vm11  ;;  %vm456_vm12 = vcmp.eq.s32.totalorder %v1025_v44, %v434_v6 }
 0x11c   :  { %v646_v10 = vadd.f32 %v554_v7, %v553_v5  ;;  %v272_v7 = vadd.s32 96, %v1018_v42 }
 0x11d   :  { %v780_v12 = vpop.f32.mrb[4].mxu0  ;;  %v1114_v13 = vpop.f32.mrb[4].mxu1 }
 0x11e   :  { %v647_v16 = vadd.f32 %v646_v10, %v555_v11  ;;  %v479_v17 = vmax.f32 %v776_v50, %v780_v12  ;;  %v207_v18 = vpop.f32.mrb[5].mxu0  ;;  %v1127_v19 = vpop.f32.mrb[5].mxu1  ;;  %v732_v33 = vadd.f32 -0.1, %v780_v12  ;;  %vm306_vm11 = vcmp.ne.s32.totalorder %v1020_v43, %v272_v7 }
 0x11f   :  { %v477_v22 = vmax.f32 %v1045_v53, %v207_v18  ;;  %v730_v23 = vadd.f32 -0.1, %v207_v18  ;;  %v781_v24 = vpop.f32.mrb[6].mxu0  ;;  %v1133_v25 = vpop.f32.mrb[6].mxu1  ;;  %v736_v18 = vadd.f32 -0.1, %v1042_v51 }
 0x120   :  { %v648_v26 = vadd.f32 %v647_v16, %v556_v21  ;;  %v483_v27 = vmax.f32 %v479_v17, %v1042_v51  ;;  %v480_v28 = vmax.f32 %v1061_v57, %v781_v24  ;;  %v210_v29 = vpop.f32.mrb[7].mxu0  ;;  %v1139_v30 = vpop.f32.mrb[7].mxu1  ;;  %v733_v52 = vadd.f32 -0.1, %v781_v24 }
 0x121   :  { %v557_v34 = vsel %vm1122_vm4, %v730_v23, 0.0  ;;  %v481_v35 = vmax.f32 %v477_v22, %v1047_v54  ;;  %v478_v38 = vmax.f32 %v1075_v62, %v210_v29  ;;  %v731_v39 = vadd.f32 -0.1, %v210_v29 }
 0x122   :  { %v649_v36 = vadd.f32 %v648_v26, %v557_v34  ;;  %v487_v37 = vmax.f32 %v483_v27, %v1114_v13  ;;  %v484_v50 = vmax.f32 %v480_v28, %v1063_v58  ;;  %v559_v61 = vsel %vm1162_vm10, %v732_v33, 0.0  ;;  %v440_v28 = vpop.permute.xlu0 %439  ;;  %v443_v34 = vpop.permute.xlu1 %442 }
 0x123   :  { %v485_v47 = vmax.f32 %v481_v35, %v1127_v19  ;;  %v558_v57 = vsel %vm1146_vm7, %v731_v39, 0.0  ;;  %v482_v49 = vmax.f32 %v478_v38, %v1082_v2  ;;  %vm454_vm4 = vcmp.eq.s32.totalorder %v1025_v44, %v428_v32 }
 0x124   :  { %v650_v0 = vadd.f32 %v649_v36, %v558_v57  ;;  %v488_v3 = vmax.f32 %v484_v50, %v1133_v25  ;;  %v735_v54 = vadd.f32 -0.1, %v1082_v2  ;;  %v560_v10 = vsel %vm1179_vm13, %v733_v52, 0.0  ;;  %vm1218_vm10 = vmand %vm454_vm4, %vm304_vm3  ;;  %v476_v52 = vld [vmem:[#allocation2] sm:$0x1] }
 0x125   :  { %v486_v48 = vmax.f32 %v482_v49, %v1139_v30  ;;  %vm305_vm7 = vcmp.ne.s32.totalorder %v1020_v43, %v271_v63  ;;  %v273_v16 = vadd.s32 104, %v1018_v42  ;;  %v561_v2 = vsel %vm1194_vm15, %v734_v4, 0.0  ;;  %vm1242_vm15 = vmand %vm456_vm12, %vm306_vm11 }
 0x126   :  { %v651_v8 = vadd.f32 %v650_v0, %v559_v61  ;;  %v490_v9 = vmax.f32 %v487_v37, %v488_v3  ;;  %v274_v22 = vadd.s32 112, %v1018_v42  ;;  %v737_v23 = vadd.f32 -0.1, %v1063_v58  ;;  %vm1230_vm13 = vmand %vm455_vm9, %vm305_vm7 }
 0x127   :  { %v489_v11 = vmax.f32 %v485_v47, %v486_v48  ;;  %v562_v51 = vsel %vm1206_vm5, %v735_v54, 0.0  ;;  %vm307_vm14 = vcmp.ne.s32.totalorder %v1020_v43, %v273_v16  ;;  %v275_v27 = vadd.s32 120, %v1018_v42 }
 0x128   :  { %v652_v17 = vadd.f32 %v651_v8, %v560_v10  ;;  %v563_v58 = vsel %vm1218_vm10, %v736_v18, 0.0  ;;  %v738_v31 = vadd.f32 -0.1, %v1127_v19  ;;  %vm308_vm3 = vcmp.ne.s32.totalorder %v1020_v43, %v274_v22  ;;  %vm473_vm5 = vmand %vm457_vm1, %vm307_vm14 }
 0x129   :  { %v491_v20 = vmax.f32 %v489_v11, %v490_v9  ;;  %v564_v36 = vsel %vm1230_vm13, %v737_v23, 0.0  ;;  %vm458_vm4 = vcmp.eq.s32.totalorder %v1025_v44, %v440_v28  ;;  %v739_v38 = vadd.f32 -0.1, %v1139_v30 }
 0x12a   :  { %v653_v21 = vadd.f32 %v652_v17, %v561_v2  ;;  %vm309_vm7 = vcmp.ne.s32.totalorder %v1020_v43, %v275_v27  ;;  %v740_v39 = vadd.f32 -0.1, %v1114_v13  ;;  %v565_v40 = vsel %vm1242_vm15, %v738_v31, 0.0  ;;  %vm474_vm10 = vmand %vm458_vm4, %vm308_vm3 }
 0x12b   :  { %v492_v24 = vrot.slane %v491_v20, 4  ;;  %vm459_vm9 = vcmp.eq.s32.totalorder %v1025_v44, %v443_v34  ;;  %v741_v47 = vadd.f32 -0.1, %v1133_v25  ;;  %v566_v30 = vsel %vm473_vm5, %v739_v38, 0.0 }
 0x12c   :  { %v654_v29 = vadd.f32 %v653_v21, %v562_v51  ;;  %vm475_vm11 = vmand %vm459_vm9, %vm309_vm7  ;;  %v567_v49 = vsel %vm474_vm10, %v740_v39, 0.0  ;;  %v534_v63 = vsub.s32 0, %v1018_v42  ;;  %v515_v44 = vsel %vm1054_vm6, %v1059_v56, %v1045_v53 }
 0x12d   :  { %v493_v32 = vmax.f32 %v491_v20, %v492_v24  ;;  %v568_v0 = vsel %vm475_vm11, %v741_v47, 0.0  ;;  %v516_v25 = vsel %vm1069_vm8, %v1080_v1, %v1075_v62 }
 0x12e   :  { %v655_v35 = vadd.f32 %v654_v29, %v563_v58 }
 0x12f   :  { %v494_v37 = vrot.slane %v493_v32, 2 }
 0x130   :  { %v656_v19 = vadd.f32 %v655_v35, %v564_v36 }
 0x131   :  { %v495_v41 = vmax.f32 %v493_v32, %v494_v37 }
 0x132   :  { %v657_v46 = vadd.f32 %v656_v19, %v565_v40 }
 0x133   :  { %v496_v50 = vrot.slane %v495_v41, 1 }
 0x134   :  { %v658_v57 = vadd.f32 %v657_v46, %v566_v30 }
 0x135   :  { %v497_v60 = vmax.f32 %v495_v41, %v496_v50 }
 0x136   :  { %v659_v13 = vadd.f32 %v658_v57, %v567_v49 }
 0x137   :  { %v498_v3 = vmax.f32 %v476_v52, %v497_v60 }
 0x138   :  { %v660_v4 = vadd.f32 %v659_v13, %v568_v0 }
 0x139   :  { %v535_v61 = vrot.slane %v498_v3, %v534_v63  ;;  %669 = vst [vmem:[#allocation2] sm:$0x1] %v498_v3  ;;  %v618_v12 = vsub.f32 %v476_v52, %v498_v3 }
 0x13a   :  { %v661_v48 = vrot.slane %v660_v4, 4 }
 0x13b   :  { %v537_v5 = vsub.f32 %v515_v44, %v535_v61  ;;  %v538_v6 = vsub.f32 %v516_v25, %v535_v61  ;;  %v619_v56 = vmul.f32 1.442695, %v618_v12 }
 0x13c   :  { %v662_v7 = vadd.f32 %v661_v48, %v660_v4 }
 0x13d   :  { %v569_v8 = vmul.f32 1.442695, %v537_v5  ;;  %v571_v9 = vmul.f32 1.442695, %v538_v6 }
 0x13e   :  { %v663_v54 = vrot.slane %v662_v7, 2 }
 0x13f   :  { %829 = vpow2.f32 %v569_v8 }
 0x140   :  { %831 = vpow2.f32 %v571_v9  ;;  %v664_v10 = vadd.f32 %v663_v54, %v662_v7 }
 0x141   :  { %833 = vpow2.f32 %v619_v56 }
 0x142   :  { %v665_v11 = vrot.slane %v664_v10, 1 }
 0x144   :  { %v666_v55 = vadd.f32 %v665_v11, %v664_v10 }
 0x146   :  { %v667_v53 = vadd.f32 %v666_v55, %v645_v14 }
 0x148   :  { %668 = vst [vmem:[#allocation4] sm:$0x1] %v667_v53 }
 0x149   :  { %v830_v16 = vpop.eup %829 }
 0x14a   :  { %v832_v59 = vpop.eup %831  ;;  %v601_v62 = vsel %vm294_vm0, %v830_v16, 0.0 }
 0x14b   :  { %v602_v1 = vsel %vm295_vm2, %v832_v59, 0.0 }
 0x14c   :  { %v622_v17 = vadd.f32 %v602_v1, %v601_v62 }
 0x14e   :  { %v637_v18 = vrot.slane %v622_v17, 4 }
 0x14f   :  { %v673_v2 = vld [vmem:[#allocation4] sm:$0x1] }
 0x150   :  { %v638_v20 = vadd.f32 %v637_v18, %v622_v17  ;;  %674 = vst [vmem:[#allocation5] sm:$0x1] %v673_v2 }
 0x151   :  { %848 = shalt.err (!%p845_p4)
}
 0x152   :  { %s849_s11 = scalar_lea.hbm %s1302_s4, 16 }
 0x153   :  { %p850_p5 = scmp.ne.s32.totalorder %s1302_s4, %s849_s11  ;;  %p853_p6 = scmp.lt.u32.totalorder %s849_s11, %s1302_s4 }
 0x155   :  { %p855_p7 = pnand %p853_p6, %p850_p5 }
 0x157   :  { %858 = shalt.err (!%p855_p7)
}
 0x158   :  { %690 = dma.vmem_to_hbm [thread:$0]  %s688_s6, 16, %s1302_s4, [#allocation6]   ;;  %v639_v42 = vrot.slane %v638_v20, 2  ;;  %v834_v45 = vpop.eup %833  ;;  %v617_v15 = vld [vmem:[#allocation3] sm:$0x1] }
 0x159   :  { %v621_v22 = vmul.f32 %v834_v45, %v617_v15  ;;  %s889_s18 = smov [#allocation7]   ;;  %v675_v28 = vld [vmem:[#allocation2] sm:$0x1] }
 0x15a   :  { %v640_v43 = vadd.f32 %v639_v42, %v638_v20  ;;  %s697_s19 = sshll.u32 %s889_s18, 4  ;;  %s698_s19 = int_to_ptr.vmem [resolvable:$true] %s697_s19 }
 0x15b   :  { %s859_s4 = scalar_lea.vmem %s698_s19, 16  ;;  %s863_s20 = scalar_lea.vmem %s698_s19, 32 }
 0x15c   :  { %v641_v21 = vrot.slane %v640_v43, 1  ;;  %p860_p8 = scmp.ne.s32.totalorder %s698_s19, %s859_s4  ;;  %p864_p9 = scmp.lt.s32.totalorder %s698_s19, %s698_s19 }
 0x15d   :  { %p865_p10 = scmp.lt.s32.totalorder %s863_s20, %s859_s4 }
 0x15e   :  { %v642_v23 = vadd.f32 %v641_v21, %v640_v43 }
 0x15f   :  { %p866_p11 = por %p865_p10, %p864_p9 }
 0x160   :  { %v643_v51 = vadd.f32 %v642_v23, %v621_v22 }
 0x161   :  { %p867_p12 = pnand %p866_p11, %p860_p8 }
 0x162   :  { %644 = vst [vmem:[#allocation3] sm:$0x1] %v643_v51 }
 0x169   :  { %v676_v24 = vld [vmem:[#allocation3] sm:$0x1] }
 0x16a   :  { %835 = vlog2.f32 %v676_v24 }
 0x174   :  { %v836_v26 = vpop.eup %835 }
 0x175   :  { %v678_v27 = vmul.f32 0.6931472, %v836_v26 }
 0x177   :  { %v679_v29 = vadd.f32 %v678_v27, %v675_v28 }
 0x179   :  { %680 = vst [vmem:[#allocation7] sm:$0x1] %v679_v29 }
 0x17a   :  { %870 = shalt.err (!%p867_p12)
}
 0x17b   :  { %s871_s22 = scalar_lea.hbm %s1303_s5, 16 }
 0x17c   :  { %p872_p13 = scmp.ne.s32.totalorder %s1303_s5, %s871_s22  ;;  %p875_p0 = scmp.lt.u32.totalorder %s871_s22, %s1303_s5 }
 0x17e   :  { %p877_p1 = pnand %p875_p0, %p872_p13 }
 0x180   :  { %880 = shalt.err (!%p877_p1)
}
 0x181   :  { %700 = dma.vmem_to_hbm [thread:$0]  %s698_s19, 16, %s1303_s5, [#allocation8]  }
 0x182   :  { %881 = dma.done.wait [#allocation6], 16  }
 0x183   :  { %882 = vsyncadd [#allocation6], 4294967280 }
 0x184   :  { %883 = dma.done.wait [#allocation8], 16  }
 0x185   :  { %884 = vsyncadd [#allocation8], 4294967280 }
 0x186   :  { %707 = vsyncpa [#allocation6], 1 }
 0x187   :  { %708 = vsyncpa [#allocation8], 1 }

</bundles_post_ra>
